<compile_context>
chip_gen: v7x
topology: tpu7x:2x2x1
jax: 0.10.0
libtpu: 0.0.40
codegen_flags: <defaults>
</compile_context>

<pallas_src>
import math
import functools

import jax
import jax.numpy as jnp
from jax import lax
from jax.experimental import pallas as pl
from jax.experimental.pallas import tpu as pltpu


# ------------------------------ helpers ------------------------------------

def _round_up(n, m):
    return ((n + m - 1) // m) * m


def _vmem_limit_bytes():
    """~3/4 of physical VMEM: ~96 MiB on v5e/v6e (128 MiB), ~48 MiB on v7x (64 MiB)."""
    try:
        cap = pltpu.get_tpu_info().vmem_capacity_bytes
    except Exception:
        cap = 128 * 1024 * 1024
    return int(min(cap * 3 // 4, 100 * 1024 * 1024))


def _q_tile(T):
    for t in (512, 256, 128, 64, 32, 16, 8):
        if T % t == 0:
            return t
    return T  # T not a multiple of 8 -> single full block


# ----------------------------- Pallas kernels -------------------------------

def _qkv_kernel(x_ref, s_ref, wq_ref, bq_ref, wkv_ref, bkv_ref,
                q_ref, k_ref, v_ref):
    """Fused Q / K / V projections for one row tile.

    x:   (TILE_N, C) -> q = x @ Wq_scaled + bq_scaled   (1/sqrt(hs) pre-folded)
    src: (TILE_N, C) -> [k | v] = src @ Wkv + bkv       (Wkv = [Wk | Wv])
    """
    C = wq_ref.shape[1]
    q = jnp.dot(x_ref[...], wq_ref[...],
                preferred_element_type=jnp.float32) + bq_ref[...]
    kv = jnp.dot(s_ref[...], wkv_ref[...],
                 preferred_element_type=jnp.float32) + bkv_ref[...]
    q_ref[...] = q.astype(q_ref.dtype)
    k_ref[...] = kv[:, :C].astype(k_ref.dtype)
    v_ref[...] = kv[:, C:].astype(v_ref.dtype)


def _attn_proj_kernel(q_ref, k_ref, v_ref, wp_ref, bp_ref, o_ref, y_scr,
                      *, n_head):
    """Multi-head attention + fused output projection for one (b, q-tile) block.

    q_ref: (1, TQ, C)   k_ref/v_ref: (1, T, C)   o_ref: (1, TQ, C)
    y_scr: (TQ, C) VMEM scratch holding the merged per-head attention output.
    Heads are static channel slices -> no head split/merge transposes.
    The output projection runs once after the head loop (full-C contraction).
    """
    C = q_ref.shape[2]
    hs = C // n_head

    for h in range(n_head):                       # static; temps die each iter
        sl = slice(h * hs, (h + 1) * hs)
        qh = q_ref[0, :, sl]                      # (TQ, hs); scale pre-folded
        kh = k_ref[0, :, sl]                      # (T,  hs)
        # scores: contract last dims directly -> no explicit k.T materialized
        s = lax.dot_general(qh, kh, (((1,), (1,)), ((), ())),
                            preferred_element_type=jnp.float32)    # (TQ, T) f32
        s = s - jnp.max(s, axis=-1, keepdims=True)
        p = jnp.exp(s)
        p = p * pl.reciprocal(jnp.sum(p, axis=-1, keepdims=True), approx=False)
        # attn_drop: identity at inference time
        yh = jnp.dot(p.astype(v_ref.dtype), v_ref[0, :, sl],
                     preferred_element_type=jnp.float32)           # (TQ, hs)
        y_scr[:, sl] = yh.astype(y_scr.dtype)     # store -> bounds live range

    # Single full-C projection GEMM (full MXU contraction depth).
    # resid_drop: identity at inference time.
    o_ref[0] = (jnp.dot(y_scr[...], wp_ref[...],
                        preferred_element_type=jnp.float32)
                + bp_ref[...]).astype(o_ref.dtype)


# ------------------------------ JAX wrappers --------------------------------

def pallas_qkv_proj(x2d, s2d, wq, bq, wkv, bkv):
    """x2d, s2d: (N, C);  wq: (C, C);  wkv: (C, 2C)  ->  q, k, v each (N, C)."""
    N, C = x2d.shape
    C2 = wkv.shape[1]

    # Keep the MXU M dimension large: target 512-row tiles, pad N if needed.
    tile = min(512, _round_up(N, 8))
    Np = _round_up(N, tile)
    if Np != N:
        pad = ((0, Np - N), (0, 0))
        x2d = jnp.pad(x2d, pad)
        s2d = jnp.pad(s2d, pad)

    row_spec = pl.BlockSpec((tile, C), lambda i: (i, 0))
    # Constant-index weights/biases: single buffer (no pointless double copy).
    const = lambda shape: pl.BlockSpec(shape, lambda i: (0, 0),
                                       pipeline_mode=pl.Buffered(1))

    q, k, v = pl.pallas_call(
        _qkv_kernel,
        out_shape=(jax.ShapeDtypeStruct((Np, C), x2d.dtype),
                   jax.ShapeDtypeStruct((Np, C), x2d.dtype),
                   jax.ShapeDtypeStruct((Np, C), x2d.dtype)),
        grid_spec=pltpu.PrefetchScalarGridSpec(
            num_scalar_prefetch=0,
            grid=(Np // tile,),
            in_specs=[row_spec,                   # x rows
                      row_spec,                   # src rows
                      const((C, C)),              # Wq   (resident)
                      const((1, C)),              # bq
                      const((C, C2)),             # Wkv  (resident)
                      const((1, C2))],            # bkv
            out_specs=[row_spec, row_spec, row_spec],
        ),
        compiler_params=pltpu.CompilerParams(
            dimension_semantics=("parallel",),
            vmem_limit_bytes=_vmem_limit_bytes()),
    )(x2d, s2d, wq, bq.reshape(1, C), wkv, bkv.reshape(1, C2))

    if Np != N:
        q, k, v = q[:N], k[:N], v[:N]
    return q, k, v


def pallas_mha_proj(q, k, v, wp, bp, n_head, out_dtype):
    """q, k, v: (B, T, C) -> proj(multi_head_attention(q, k, v)) : (B, T, C)."""
    B, T, C = q.shape
    TQ = _q_tile(T)
    kernel = functools.partial(_attn_proj_kernel, n_head=n_head)

    q_spec = pl.BlockSpec((1, TQ, C), lambda b, qt: (b, qt, 0))
    kv_spec = pl.BlockSpec((1, T, C), lambda b, qt: (b, 0, 0))   # ignores q-tile
    const = lambda shape: pl.BlockSpec(shape, lambda b, qt: (0, 0),
                                       pipeline_mode=pl.Buffered(1))

    return pl.pallas_call(
        kernel,
        out_shape=jax.ShapeDtypeStruct((B, T, C), out_dtype),
        grid_spec=pltpu.PrefetchScalarGridSpec(
            num_scalar_prefetch=0,
            grid=(B, T // TQ),
            in_specs=[q_spec, kv_spec, kv_spec,
                      const((C, C)),              # proj_w (resident)
                      const((1, C))],             # proj_b
            out_specs=q_spec,
            scratch_shapes=[pltpu.VMEM((TQ, C), q.dtype)],   # merged-head y
        ),
        compiler_params=pltpu.CompilerParams(
            dimension_semantics=("parallel", "parallel"),
            vmem_limit_bytes=_vmem_limit_bytes()),
    )(q, k, v, wp, bp.reshape(1, C))


def cross_attention_forward(params, x, src_encode, n_head, compute_dtype=None):
    """Equivalent of cross_Attention.forward with epipolar=None (eval mode).

    compute_dtype: dtype used for MXU matmul operands (e.g. jnp.bfloat16);
    accumulation and softmax statistics stay in float32.
    """
    B, T, C = x.shape
    out_dtype = x.dtype
    cdt = compute_dtype or x.dtype
    hs = C // n_head
    scale = 1.0 / math.sqrt(hs)

    # Fold 1/sqrt(hs) into the f32 query weights/bias (removes a (T,C) VPU
    # multiply per grid step and keeps the scaling in f32 on the bf16 path).
    wq = (params["query_w"].astype(jnp.float32) * scale).astype(cdt)
    bq = params["query_b"].astype(jnp.float32) * scale
    wkv = jnp.concatenate([params["key_w"], params["value_w"]], axis=1).astype(cdt)
    bkv = jnp.concatenate([params["key_b"], params["value_b"]]).astype(jnp.float32)
    wp = params["proj_w"].astype(cdt)
    bp = params["proj_b"].astype(jnp.float32)

    x2d = x.reshape(B * T, C).astype(cdt)
    s2d = src_encode.reshape(B * T, C).astype(cdt)

    q2d, k2d, v2d = pallas_qkv_proj(x2d, s2d, wq, bq, wkv, bkv)

    # (N, C) -> (B, T, C): pure metadata reshape, no transpose / data movement.
    q = q2d.reshape(B, T, C)
    k = k2d.reshape(B, T, C)
    v = v2d.reshape(B, T, C)

    return pallas_mha_proj(q, k, v, wp, bp, n_head, out_dtype)


# -------------------------------- reference ---------------------------------

def reference_forward(params, x, src_encode, n_head):
    B, T, C = x.shape
    hs = C // n_head
    lin = lambda t, w, b: t @ w + b
    k = lin(src_encode, params["key_w"], params["key_b"])
    q = lin(x, params["query_w"], params["query_b"])
    v = lin(src_encode, params["value_w"], params["value_b"])
    heads = lambda t: t.reshape(B, T, n_head, hs).transpose(0, 2, 1, 3)
    qh, kh, vh = heads(q), heads(k), heads(v)
    att = jnp.einsum("bhqd,bhkd->bhqk", qh, kh) * (1.0 / math.sqrt(hs))
    att = jax.nn.softmax(att, axis=-1)
    y = jnp.einsum("bhqk,bhkd->bhqd", att, vh)
    y = y.transpose(0, 2, 1, 3).reshape(B, T, C)
    return lin(y, params["proj_w"], params["proj_b"])


# ---------------------------------- main -------------------------------------

if __name__ == "__main__":
    B, T, C, n_head = 2, 8, 32, 4       # small shapes consistent with module

    key = jax.random.PRNGKey(0)
    keys = jax.random.split(key, 8)

    def init_w(k, cin, cout):
        return jax.random.normal(k, (cin, cout), jnp.float32) * 0.02

    params = {
        "key_w":   init_w(keys[0], C, C), "key_b":   jnp.zeros((C,), jnp.float32),
        "query_w": init_w(keys[1], C, C), "query_b": jnp.zeros((C,), jnp.float32),
        "value_w": init_w(keys[2], C, C), "value_b": jnp.zeros((C,), jnp.float32),
        "proj_w":  init_w(keys[3], C, C), "proj_b":  jnp.zeros((C,), jnp.float32),
    }

    x = jax.random.normal(keys[4], (B, T, C), jnp.float32)
    src_encode = jax.random.normal(keys[5], (B, T, C), jnp.float32)

    ref = reference_forward(params, x, src_encode, n_head)

    # f32 compute path
    out = cross_attention_forward(params, x, src_encode, n_head)
    out = jax.block_until_ready(out)
    assert out.shape == (B, T, C)
    assert jnp.allclose(out, ref, rtol=1e-2, atol=1e-4), "f32 mismatch vs reference"

    # bf16 MXU-operand path (f32 accumulation + f32 softmax stats)
    out_bf16 = cross_attention_forward(params, x, src_encode, n_head,
                                       compute_dtype=jnp.bfloat16)
    out_bf16 = jax.block_until_ready(out_bf16)
    assert out_bf16.shape == (B, T, C)
    assert bool(jnp.all(jnp.isfinite(out_bf16)))
    assert jnp.allclose(out_bf16, ref, rtol=1e-1, atol=5e-3), "bf16 path mismatch"

    print("KERNEL_OK")
</pallas_src>

<mosaic_0001>
module attributes {stable_mosaic.version = 11 : i64} {
  func.func @_qkv_kernel(%arg0: i32, %arg1: memref<16x32xf32, #tpu.memory_space<vmem>>, %arg2: memref<16x32xf32, #tpu.memory_space<vmem>>, %arg3: memref<32x32xf32, #tpu.memory_space<vmem>>, %arg4: memref<1x32xf32, #tpu.memory_space<vmem>>, %arg5: memref<32x64xf32, #tpu.memory_space<vmem>>, %arg6: memref<1x64xf32, #tpu.memory_space<vmem>>, %arg7: memref<16x32xf32, #tpu.memory_space<vmem>>, %arg8: memref<16x32xf32, #tpu.memory_space<vmem>>, %arg9: memref<16x32xf32, #tpu.memory_space<vmem>>) attributes {dimension_semantics = [#tpu.dimension_semantics<parallel>], iteration_bounds = array<i64: 1>, scalar_prefetch = 0 : i64, scratch_operands = 0 : i64, tpu.core_type = #tpu.core_type<tc>, window_params = [{transform_indices = @transform_0, window_bounds = array<i64: 16, 32>}, {transform_indices = @transform_1, window_bounds = array<i64: 16, 32>}, {pipeline_mode = #tpu.pipeline_mode<synchronous>, transform_indices = @transform_2, window_bounds = array<i64: 32, 32>}, {pipeline_mode = #tpu.pipeline_mode<synchronous>, transform_indices = @transform_3, window_bounds = array<i64: 1, 32>}, {pipeline_mode = #tpu.pipeline_mode<synchronous>, transform_indices = @transform_4, window_bounds = array<i64: 32, 64>}, {pipeline_mode = #tpu.pipeline_mode<synchronous>, transform_indices = @transform_5, window_bounds = array<i64: 1, 64>}, {transform_indices = @transform_6, window_bounds = array<i64: 16, 32>}, {transform_indices = @transform_7, window_bounds = array<i64: 16, 32>}, {transform_indices = @transform_8, window_bounds = array<i64: 16, 32>}]} {
    %c0 = arith.constant 0 : index
    %c0_0 = arith.constant 0 : index
    %0 = vector.load %arg1[%c0, %c0_0] : memref<16x32xf32, #tpu.memory_space<vmem>>, vector<16x32xf32>
    %c0_1 = arith.constant 0 : index
    %c0_2 = arith.constant 0 : index
    %1 = vector.load %arg3[%c0_1, %c0_2] : memref<32x32xf32, #tpu.memory_space<vmem>>, vector<32x32xf32>
    %cst = arith.constant dense<0.000000e+00> : vector<16x32xf32>
    %2 = tpu.matmul %0, %1, %cst {dimension_numbers = #tpu.dot_dimension_numbers<[1], [0], [0], [1], [0, 0, 1, 1], [], []>} : vector<16x32xf32>, vector<32x32xf32>, vector<16x32xf32> -> vector<16x32xf32>
    %c0_3 = arith.constant 0 : index
    %c0_4 = arith.constant 0 : index
    %3 = vector.load %arg4[%c0_3, %c0_4] : memref<1x32xf32, #tpu.memory_space<vmem>>, vector<1x32xf32>
    %4 = vector.broadcast %3 : vector<1x32xf32> to vector<16x32xf32>
    %5 = arith.addf %2, %4 : vector<16x32xf32>
    %c0_5 = arith.constant 0 : index
    %c0_6 = arith.constant 0 : index
    %6 = vector.load %arg2[%c0_5, %c0_6] : memref<16x32xf32, #tpu.memory_space<vmem>>, vector<16x32xf32>
    %c0_7 = arith.constant 0 : index
    %c0_8 = arith.constant 0 : index
    %7 = vector.load %arg5[%c0_7, %c0_8] : memref<32x64xf32, #tpu.memory_space<vmem>>, vector<32x64xf32>
    %cst_9 = arith.constant dense<0.000000e+00> : vector<16x64xf32>
    %8 = tpu.matmul %6, %7, %cst_9 {dimension_numbers = #tpu.dot_dimension_numbers<[1], [0], [0], [1], [0, 0, 1, 1], [], []>} : vector<16x32xf32>, vector<32x64xf32>, vector<16x64xf32> -> vector<16x64xf32>
    %c0_10 = arith.constant 0 : index
    %c0_11 = arith.constant 0 : index
    %9 = vector.load %arg6[%c0_10, %c0_11] : memref<1x64xf32, #tpu.memory_space<vmem>>, vector<1x64xf32>
    %10 = vector.broadcast %9 : vector<1x64xf32> to vector<16x64xf32>
    %11 = arith.addf %8, %10 : vector<16x64xf32>
    %c0_12 = arith.constant 0 : index
    %c0_13 = arith.constant 0 : index
    %12 = vector.load %arg7[%c0_12, %c0_13] : memref<16x32xf32, #tpu.memory_space<vmem>>, vector<16x32xf32>
    tpu.vector_store %arg7[%c0_12, %c0_13], %5 {strides = array<i32>} : memref<16x32xf32, #tpu.memory_space<vmem>>, vector<16x32xf32>,
    %13 = vector.extract_strided_slice %11 {offsets = [0, 0], sizes = [16, 32], strides = [1, 1]} : vector<16x64xf32> to vector<16x32xf32>
    %c0_14 = arith.constant 0 : index
    %c0_15 = arith.constant 0 : index
    %14 = vector.load %arg8[%c0_14, %c0_15] : memref<16x32xf32, #tpu.memory_space<vmem>>, vector<16x32xf32>
    tpu.vector_store %arg8[%c0_14, %c0_15], %13 {strides = array<i32>} : memref<16x32xf32, #tpu.memory_space<vmem>>, vector<16x32xf32>,
    %15 = vector.extract_strided_slice %11 {offsets = [0, 32], sizes = [16, 32], strides = [1, 1]} : vector<16x64xf32> to vector<16x32xf32>
    %c0_16 = arith.constant 0 : index
    %c0_17 = arith.constant 0 : index
    %16 = vector.load %arg9[%c0_16, %c0_17] : memref<16x32xf32, #tpu.memory_space<vmem>>, vector<16x32xf32>
    tpu.vector_store %arg9[%c0_16, %c0_17], %15 {strides = array<i32>} : memref<16x32xf32, #tpu.memory_space<vmem>>, vector<16x32xf32>,
    return
  }
  func.func @transform_0(%arg0: i32) -> (i32, i32) {
    %c0_i32 = arith.constant 0 : i32
    %c0_i32_0 = arith.constant 0 : i32
    return %arg0, %c0_i32 : i32, i32
  }
  func.func @transform_1(%arg0: i32) -> (i32, i32) {
    %c0_i32 = arith.constant 0 : i32
    %c0_i32_0 = arith.constant 0 : i32
    return %arg0, %c0_i32 : i32, i32
  }
  func.func @transform_2(%arg0: i32) -> (i32, i32) {
    %c0_i32 = arith.constant 0 : i32
    %c0_i32_0 = arith.constant 0 : i32
    %c0_i32_1 = arith.constant 0 : i32
    return %c0_i32, %c0_i32_0 : i32, i32
  }
  func.func @transform_3(%arg0: i32) -> (i32, i32) {
    %c0_i32 = arith.constant 0 : i32
    %c0_i32_0 = arith.constant 0 : i32
    %c0_i32_1 = arith.constant 0 : i32
    return %c0_i32, %c0_i32_0 : i32, i32
  }
  func.func @transform_4(%arg0: i32) -> (i32, i32) {
    %c0_i32 = arith.constant 0 : i32
    %c0_i32_0 = arith.constant 0 : i32
    %c0_i32_1 = arith.constant 0 : i32
    return %c0_i32, %c0_i32_0 : i32, i32
  }
  func.func @transform_5(%arg0: i32) -> (i32, i32) {
    %c0_i32 = arith.constant 0 : i32
    %c0_i32_0 = arith.constant 0 : i32
    %c0_i32_1 = arith.constant 0 : i32
    return %c0_i32, %c0_i32_0 : i32, i32
  }
  func.func @transform_6(%arg0: i32) -> (i32, i32) {
    %c0_i32 = arith.constant 0 : i32
    %c0_i32_0 = arith.constant 0 : i32
    return %arg0, %c0_i32 : i32, i32
  }
  func.func @transform_7(%arg0: i32) -> (i32, i32) {
    %c0_i32 = arith.constant 0 : i32
    %c0_i32_0 = arith.constant 0 : i32
    return %arg0, %c0_i32 : i32, i32
  }
  func.func @transform_8(%arg0: i32) -> (i32, i32) {
    %c0_i32 = arith.constant 0 : i32
    %c0_i32_0 = arith.constant 0 : i32
    return %arg0, %c0_i32 : i32, i32
  }
}

</mosaic_0001>

<bundles_post_ra>
// kernel: tpu_custom_call.1
= control target key start
LH: loop header
LB: loop body
LE: loop exit
PB: predicated region body
PF: predicated region fallthrough
CT: control target
= control target key end

     0   :  { %14 = vsyncpa [#allocation3], 0  ;;  %s858_s0 = inlined_call_operand.hbm [shape: f32[16,32], index: 0, kind: input, shape index: {}]   ;;  %s859_s1 = inlined_call_operand.hbm [shape: f32[16,32], index: 1, kind: input, shape index: {}]   ;;  %s860_s2 = inlined_call_operand.hbm [shape: f32[32,32], index: 2, kind: input, shape index: {}]   ;;  %s861_s3 = inlined_call_operand.hbm [shape: f32[1,32], index: 3, kind: input, shape index: {}]   ;;  %s862_s4 = inlined_call_operand.hbm [shape: f32[32,64], index: 4, kind: input, shape index: {}]   ;;  %s863_s5 = inlined_call_operand.hbm [shape: f32[1,64], index: 5, kind: input, shape index: {}]   ;;  %s864_s6 = inlined_call_operand.hbm [shape: f32[16,32], index: 6, kind: output, shape index: {0}]   ;;  %s865_s7 = inlined_call_operand.hbm [shape: f32[16,32], index: 7, kind: output, shape index: {1}]   ;;  %s866_s8 = inlined_call_operand.hbm [shape: f32[16,32], index: 8, kind: output, shape index: {2}]  }
   0x1   :  { %15 = vsyncpa [#allocation6], 0 }
   0x2   :  { %16 = vsyncpa [#allocation9], 0 }
   0x3   :  { %17 = vsyncpa [#allocation12], 0 }
   0x4   :  { %18 = vsyncpa [#allocation4], 0 }
   0x5   :  { %19 = vsyncpa [#allocation15], 0  ;;  %s638_s27 = smov [#allocation5]   ;;  %s639_s29 = smov [#allocation8]  }
   0x6   :  { %s37_s28 = sshll.u32 %s638_s27, 4  ;;  %s62_s30 = sshll.u32 %s639_s29, 4  ;;  %s38_s28 = int_to_ptr.vmem [resolvable:$true] %s37_s28  ;;  %s695_s30 = int_to_ptr.vmem [resolvable:$true] %s62_s30 }
   0x7   :  { %s428_s11 = scalar_lea.hbm %s859_s1, 256 }
   0x8   :  { %p429_p0 = scmp.ne.s32.totalorder %s859_s1, %s428_s11  ;;  %p432_p1 = scmp.lt.u32.totalorder %s428_s11, %s859_s1 }
   0xa   :  { %p434_p2 = pnand %p432_p1, %p429_p0 }
   0xc   :  { %437 = shalt.err (!%p434_p2)
}
   0xd   :  { %s438_s16 = scalar_lea.vmem %s38_s28, 256  ;;  %p443_p4 = scmp.lt.s32.totalorder %s38_s28, %s38_s28 }
   0xe   :  { %p439_p3 = scmp.ne.s32.totalorder %s38_s28, %s438_s16  ;;  %p444_p5 = scmp.lt.s32.totalorder %s438_s16, %s438_s16 }
  0x10   :  { %p445_p6 = por %p444_p5, %p443_p4 }
  0x12   :  { %p446_p7 = pnand %p445_p6, %p439_p3 }
  0x14   :  { %449 = shalt.err (!%p446_p7)
}
  0x15   :  { %s640_s17 = smov 128   ;;  %s641_s18 = smov 8  }
  0x16   :  { %43 = dma.hbm_to_vmem [thread:$0]  %s859_s1, 256, %s38_s28, [#allocation6], %s640_s17, %s640_s17, %s641_s18  }
  0x17   :  { %s450_s23 = scalar_lea.hbm %s861_s3, 16 }
  0x18   :  { %p451_p8 = scmp.ne.s32.totalorder %s861_s3, %s450_s23  ;;  %p454_p9 = scmp.lt.u32.totalorder %s450_s23, %s861_s3 }
  0x1a   :  { %p456_p10 = pnand %p454_p9, %p451_p8 }
  0x1c   :  { %459 = shalt.err (!%p456_p10)
}
  0x1d   :  { %s460_s29 = scalar_lea.vmem %s695_s30, 16  ;;  %s464_s1 = scalar_lea.vmem %s695_s30, 32 }
  0x1e   :  { %p461_p11 = scmp.ne.s32.totalorder %s695_s30, %s460_s29  ;;  %p465_p12 = scmp.lt.s32.totalorder %s695_s30, %s695_s30 }
  0x1f   :  { %p466_p13 = scmp.lt.s32.totalorder %s464_s1, %s460_s29 }
  0x21   :  { %p467_p0 = por %p466_p13, %p465_p12 }
  0x23   :  { %p468_p1 = pnand %p467_p0, %p461_p11 }
  0x25   :  { %471 = shalt.err (!%p468_p1)
}
  0x26   :  { %65 = dma.hbm_to_vmem [thread:$0]  %s861_s3, 16, %s695_s30, [#allocation9]  }
  0x27   :  { %s642_s10 = smov [#allocation2]   ;;  %s643_s12 = smov [#allocation7]  }
  0x28   :  { %s25_s11 = sshll.u32 %s642_s10, 4  ;;  %s49_s13 = sshll.u32 %s643_s12, 4  ;;  %s26_s11 = int_to_ptr.vmem [resolvable:$true] %s25_s11  ;;  %s730_s13 = int_to_ptr.vmem [resolvable:$true] %s49_s13 }
  0x29   :  { %s472_s16 = scalar_lea.hbm %s858_s0, 256 }
  0x2a   :  { %p473_p2 = scmp.ne.s32.totalorder %s858_s0, %s472_s16  ;;  %p476_p3 = scmp.lt.u32.totalorder %s472_s16, %s858_s0 }
  0x2c   :  { %p478_p4 = pnand %p476_p3, %p473_p2 }
  0x2e   :  { %481 = shalt.err (!%p478_p4)
}
  0x2f   :  { %s482_s3 = scalar_lea.vmem %s26_s11, 256  ;;  %p487_p6 = scmp.lt.s32.totalorder %s26_s11, %s26_s11 }
  0x30   :  { %p483_p5 = scmp.ne.s32.totalorder %s26_s11, %s482_s3  ;;  %p488_p7 = scmp.lt.s32.totalorder %s482_s3, %s482_s3 }
  0x32   :  { %p489_p8 = por %p488_p7, %p487_p6 }
  0x34   :  { %p490_p9 = pnand %p489_p8, %p483_p5 }
  0x36   :  { %493 = shalt.err (!%p490_p9)
}
  0x37   :  { %31 = dma.hbm_to_vmem [thread:$0]  %s858_s0, 256, %s26_s11, [#allocation3], %s640_s17, %s640_s17, %s641_s18  }
  0x38   :  { %s494_s26 = scalar_lea.hbm %s860_s2, 512 }
  0x39   :  { %p495_p10 = scmp.ne.s32.totalorder %s860_s2, %s494_s26  ;;  %p498_p11 = scmp.lt.u32.totalorder %s494_s26, %s860_s2 }
  0x3b   :  { %p500_p12 = pnand %p498_p11, %p495_p10 }
  0x3d   :  { %503 = shalt.err (!%p500_p12)
}
  0x3e   :  { %s504_s9 = scalar_lea.vmem %s730_s13, 512  ;;  %p509_p0 = scmp.lt.s32.totalorder %s730_s13, %s730_s13 }
  0x3f   :  { %p505_p13 = scmp.ne.s32.totalorder %s730_s13, %s504_s9  ;;  %p510_p1 = scmp.lt.s32.totalorder %s504_s9, %s504_s9 }
  0x41   :  { %p511_p2 = por %p510_p1, %p509_p0 }
  0x43   :  { %p512_p3 = pnand %p511_p2, %p505_p13 }
  0x45   :  { %515 = shalt.err (!%p512_p3)
}
  0x46   :  { %55 = dma.hbm_to_vmem [thread:$0]  %s860_s2, 512, %s730_s13, [#allocation6], %s640_s17, %s640_s17, %s641_s18  }
  0x47   :  { %s644_s11 = smov [#allocation10]   ;;  %s645_s14 = smov [#allocation11]  }
  0x48   :  { %s71_s12 = sshll.u32 %s644_s11, 4  ;;  %s84_s15 = sshll.u32 %s645_s14, 4  ;;  %s72_s12 = int_to_ptr.vmem [resolvable:$true] %s71_s12  ;;  %s85_s15 = int_to_ptr.vmem [resolvable:$true] %s84_s15 }
  0x49   :  { %s516_s20 = scalar_lea.hbm %s862_s4, 512 }
  0x4a   :  { %p517_p4 = scmp.ne.s32.totalorder %s862_s4, %s516_s20  ;;  %p520_p5 = scmp.lt.u32.totalorder %s516_s20, %s862_s4 }
  0x4c   :  { %p522_p6 = pnand %p520_p5, %p517_p4 }
  0x4e   :  { %525 = shalt.err (!%p522_p6)
}
  0x4f   :  { %s526_s2 = scalar_lea.vmem %s72_s12, 512  ;;  %p531_p8 = scmp.lt.s32.totalorder %s72_s12, %s72_s12 }
  0x50   :  { %p527_p7 = scmp.ne.s32.totalorder %s72_s12, %s526_s2  ;;  %p532_p9 = scmp.lt.s32.totalorder %s526_s2, %s526_s2 }
  0x52   :  { %p533_p10 = por %p532_p9, %p531_p8 }
  0x54   :  { %p534_p11 = pnand %p533_p10, %p527_p7 }
  0x56   :  { %537 = shalt.err (!%p534_p11)
}
  0x57   :  { %77 = dma.hbm_to_vmem [thread:$0]  %s862_s4, 512, %s72_s12, [#allocation9], %s640_s17, %s640_s17, %s641_s18  }
  0x58   :  { %s538_s26 = scalar_lea.hbm %s863_s5, 16 }
  0x59   :  { %p539_p12 = scmp.ne.s32.totalorder %s863_s5, %s538_s26  ;;  %p542_p13 = scmp.lt.u32.totalorder %s538_s26, %s863_s5 }
  0x5b   :  { %p544_p0 = pnand %p542_p13, %p539_p12 }
  0x5d   :  { %547 = shalt.err (!%p544_p0)
}
  0x5e   :  { %s548_s9 = scalar_lea.vmem %s85_s15, 16  ;;  %s552_s0 = scalar_lea.vmem %s85_s15, 32 }
  0x5f   :  { %p549_p1 = scmp.ne.s32.totalorder %s85_s15, %s548_s9  ;;  %p553_p2 = scmp.lt.s32.totalorder %s85_s15, %s85_s15 }
  0x60   :  { %p554_p3 = scmp.lt.s32.totalorder %s552_s0, %s548_s9 }
  0x62   :  { %p555_p4 = por %p554_p3, %p553_p2 }
  0x64   :  { %p556_p5 = pnand %p555_p4, %p549_p1 }
  0x66   :  { %559 = shalt.err (!%p556_p5)
}
  0x67   :  { %87 = dma.hbm_to_vmem [thread:$0]  %s863_s5, 16, %s85_s15, [#allocation12]  }
  0x68   :  { %626 = dma.done.wait [#allocation3], 256  }
  0x69   :  { %627 = vsyncadd [#allocation3], 4294967040 }
  0x6a   :  { %628 = dma.done.wait [#allocation6], 768  }
  0x6b   :  { %629 = vsyncadd [#allocation6], 4294966528 }
  0x6c   :  { %630 = dma.done.wait [#allocation9], 528  }
  0x6d   :  { %631 = vsyncadd [#allocation9], 4294966768 }
  0x6e   :  { %632 = dma.done.wait [#allocation12], 16  }
  0x6f   :  { %633 = vsyncadd [#allocation12], 4294967280  ;;  %vm119_vm0 = vcmask 261120   ;;  %v203_v0 = vld [vmem:[#allocation10] sm:$0xff]  ;;  %v204_v1 = vld [vmem:[#allocation10 + $0x8] sm:$0xff]  ;;  %s646_s5 = smov [#allocation14]  }
  0x70   :  { %v205_v2 = vld [vmem:[#allocation10 + $0x10] sm:$0xff]  ;;  %v408_v3 = vpack.c.bf16 %v204_v1, %v203_v0  ;;  %v206_v4 = vld [vmem:[#allocation10 + $0x18] sm:$0xff]  ;;  %v109_v8 = vld [vmem:[#allocation7 + $0x8] sm:$0xff]  ;;  %s326_s11 = sshll.u32 %s646_s5, 4  ;;  %s647_s12 = smov [#allocation13]   ;;  %s327_s11 = int_to_ptr.vmem [resolvable:$true] %s326_s11 }
  0x71   :  { %v201_v5 = vld [vmem:[#allocation5] sm:$0xff]  ;;  %v412_v6 = vpack.c.bf16 %v206_v4, %v205_v2  ;;  %v108_v7 = vld [vmem:[#allocation7] sm:$0xff]  ;;  %v111_v11 = vld [vmem:[#allocation7 + $0x18] sm:$0xff]  ;;  %s314_s14 = sshll.u32 %s647_s12, 4  ;;  %s648_s15 = smov 96   ;;  %s801_s14 = int_to_ptr.vmem [resolvable:$true] %s314_s14 }
  0x72   :  { %397 = vmatprep.mubr.msk.f32.mxu1 %vm119_vm0, %v201_v5  ;;  %v110_v9 = vld [vmem:[#allocation7 + $0x10] sm:$0xff]  ;;  %409 = vmatprep.subr.bf16.mxu1 %v408_v3  ;;  %v400_v10 = vpack.c.bf16 %v109_v8, %v108_v7  ;;  %v106_v12 = vld [vmem:[#allocation2] sm:$0xff]  ;;  %v202_v14 = vld [vmem:[#allocation5 + $0x8] sm:$0xff]  ;;  %s560_s16 = scalar_lea.vmem %s327_s11, 256  ;;  %p565_p7 = scmp.lt.s32.totalorder %s327_s11, %s327_s11 }
  0x73   :  { %411 = vmatpush3.bf16.msra.mxu1 %v408_v3  ;;  %v404_v13 = vpack.c.bf16 %v111_v11, %v110_v9  ;;  %386 = vmatprep.mubr.msk.f32.mxu0 %vm119_vm0, %v106_v12  ;;  %v107_v15 = vld [vmem:[#allocation2 + $0x8] sm:$0xff]  ;;  %v363_v16 = vld [vmem:[#allocation11] ss:$0 sm:$0xff]  ;;  %v360_v18 = vld [vmem:[#allocation8] ss:$0 sm:$0xff]  ;;  %p561_p6 = scmp.ne.s32.totalorder %s327_s11, %s560_s16  ;;  %p566_p8 = scmp.lt.s32.totalorder %s560_s16, %s560_s16 }
  0x74   :  { %413 = vmatprep.subr.bf16.mxu1 %v412_v6  ;;  %401 = vmatprep.subr.bf16.mxu0 %v400_v10 }
  0x75   :  { %403 = vmatpush3.bf16.msra.mxu0 %v400_v10  ;;  %p567_p9 = por %p566_p8, %p565_p7 }
  0x76   :  { %405 = vmatprep.subr.bf16.mxu0 %v404_v13 }
  0x77   :  { %415 = vmatpush3.bf16.msra.mxu1 %v412_v6  ;;  %p568_p10 = pnand %p567_p9, %p561_p6 }
  0x79   :  { %407 = vmatpush3.bf16.msra.mxu0 %v404_v13 }
  0x7a   :  { %398 = vmatmul.mubr.msk.f32.vlgmr.msra.gmra.mrb[0].mxu1 %vm119_vm0, %v202_v14 }
  0x7c   :  { %387 = vmatmul.mubr.msk.f32.vlgmr.msra.gmra.mrb[0].mxu0 %vm119_vm0, %v107_v15 }
 0x14d   :  { %v399_v17 = vpop.f32.mrb[0].mxu1 }
 0x14e   :  { %v292_v19 = vadd.f32 %v399_v17, %v363_v16  ;;  %v286_v20 = vpop.f32.mrb[1].mxu1 }
 0x14f   :  { %v287_v21 = vadd.f32 %v363_v16, %v286_v20  ;;  %v388_v22 = vpop.f32.mrb[0].mxu0 }
 0x150   :  { %298 = vst.msk [vmem:[#allocation14 + $0x8] sm:$0xff] %vm119_vm0, %v292_v19  ;;  %v198_v23 = vadd.f32 %v388_v22, %v360_v18  ;;  %v192_v24 = vpop.f32.mrb[1].mxu0 }
 0x151   :  { %297 = vst.msk [vmem:[#allocation14] sm:$0xff] %vm119_vm0, %v287_v21  ;;  %301 = vrot.lane.b32.xlu0 %v287_v21, %s648_s15  ;;  %v193_v25 = vadd.f32 %v360_v18, %v192_v24 }
 0x152   :  { %296 = vst.msk [vmem:[#allocation13 + $0x8] sm:$0xff] %vm119_vm0, %v198_v23 }
 0x153   :  { %571 = shalt.err (!%p568_p10)
}
 0x154   :  { %s572_s21 = scalar_lea.hbm %s865_s7, 256 }
 0x155   :  { %p573_p11 = scmp.ne.s32.totalorder %s865_s7, %s572_s21  ;;  %p576_p12 = scmp.lt.u32.totalorder %s572_s21, %s865_s7 }
 0x157   :  { %p578_p13 = pnand %p576_p12, %p573_p11 }
 0x159   :  { %581 = shalt.err (!%p578_p13)
}
 0x15a   :  { %332 = dma.vmem_to_hbm [thread:$0]  %s327_s11, 256, %s865_s7, [#allocation15], %s640_s17, %s640_s17, %s641_s18   ;;  %295 = vst.msk [vmem:[#allocation13] sm:$0xff] %vm119_vm0, %v193_v25 }
 0x15b   :  { %s582_s24 = scalar_lea.vmem %s801_s14, 256  ;;  %p587_p1 = scmp.lt.s32.totalorder %s801_s14, %s801_s14 }
 0x15c   :  { %p583_p0 = scmp.ne.s32.totalorder %s801_s14, %s582_s24  ;;  %p588_p2 = scmp.lt.s32.totalorder %s582_s24, %s582_s24 }
 0x15e   :  { %p589_p3 = por %p588_p2, %p587_p1 }
 0x160   :  { %p590_p4 = pnand %p589_p3, %p583_p0 }
 0x162   :  { %593 = shalt.err (!%p590_p4)
}
 0x163   :  { %s594_s27 = scalar_lea.hbm %s864_s6, 256 }
 0x164   :  { %p595_p5 = scmp.ne.s32.totalorder %s864_s6, %s594_s27  ;;  %p598_p6 = scmp.lt.u32.totalorder %s594_s27, %s864_s6 }
 0x166   :  { %p600_p7 = pnand %p598_p6, %p595_p5 }
 0x168   :  { %603 = shalt.err (!%p600_p7)
}
 0x169   :  { %320 = dma.vmem_to_hbm [thread:$0]  %s801_s14, 256, %s864_s6, [#allocation4], %s640_s17, %s640_s17, %s641_s18  }
 0x16a   :  { %303 = vrot.lane.b32.xlu0 %v292_v19, %s648_s15  ;;  %s649_s4 = smov [#allocation16]  }
 0x16b   :  { %s338_s10 = sshll.u32 %s649_s4, 4  ;;  %s339_s10 = int_to_ptr.vmem [resolvable:$true] %s338_s10 }
 0x16c   :  { %s604_s5 = scalar_lea.vmem %s339_s10, 256  ;;  %p609_p9 = scmp.lt.s32.totalorder %s339_s10, %s339_s10 }
 0x16d   :  { %p605_p8 = scmp.ne.s32.totalorder %s339_s10, %s604_s5  ;;  %p610_p10 = scmp.lt.s32.totalorder %s604_s5, %s604_s5 }
 0x16f   :  { %p611_p11 = por %p610_p10, %p609_p9 }
 0x171   :  { %p612_p12 = pnand %p611_p11, %p605_p8 }
 0x1c3   :  { %v302_v26 = vpop.permute.xlu0 %301 }
 0x1c4   :  { %307 = vst.msk [vmem:[#allocation16] sm:$0xff] %vm119_vm0, %v302_v26 }
 0x1dc   :  { %v304_v27 = vpop.permute.xlu0 %303 }
 0x1dd   :  { %308 = vst.msk [vmem:[#allocation16 + $0x8] sm:$0xff] %vm119_vm0, %v304_v27 }
 0x1de   :  { %615 = shalt.err (!%p612_p12)
}
 0x1df   :  { %s616_s12 = scalar_lea.hbm %s866_s8, 256 }
 0x1e0   :  { %p617_p13 = scmp.ne.s32.totalorder %s866_s8, %s616_s12  ;;  %p620_p0 = scmp.lt.u32.totalorder %s616_s12, %s866_s8 }
 0x1e2   :  { %p622_p1 = pnand %p620_p0, %p617_p13 }
 0x1e4   :  { %625 = shalt.err (!%p622_p1)
}
 0x1e5   :  { %344 = dma.vmem_to_hbm [thread:$0]  %s339_s10, 256, %s866_s8, [#allocation15], %s640_s17, %s640_s17, %s641_s18  }
 0x1e6   :  { %634 = dma.done.wait [#allocation4], 256  }
 0x1e7   :  { %635 = vsyncadd [#allocation4], 4294967040 }
 0x1e8   :  { %636 = dma.done.wait [#allocation15], 512  }
 0x1e9   :  { %637 = vsyncadd [#allocation15], 4294966784 }
 0x1ea   :  { %354 = vsyncpa [#allocation3], 1 }
 0x1eb   :  { %355 = vsyncpa [#allocation6], 1 }
 0x1ec   :  { %356 = vsyncpa [#allocation9], 1 }
 0x1ed   :  { %357 = vsyncpa [#allocation12], 1 }
 0x1ee   :  { %358 = vsyncpa [#allocation4], 1 }
 0x1ef   :  { %359 = vsyncpa [#allocation15], 1 }

</bundles_post_ra>
